<compile_context>
chip_gen: v5e
topology: v5e:2x2
jax: 0.10.0
libtpu: 0.0.40
codegen_flags: <defaults>
</compile_context>

<pallas_src>
import functools

import jax
import jax.numpy as jnp
from jax import lax
from jax.experimental import pallas as pl
from jax.experimental.pallas import tpu as pltpu


# ----------------------------- config (small) ------------------------------
EMB_DIM = 32            # config.emb_dim (CLIP feature dim stand-in)
NEURONS = 64            # config.neurons_per_layer
HIDDEN_LAYERS = 2       # config.hidden_layers  (=> 1 mid layer in MLP)
BSZ = 2
NUM_CAPTIONS = 4
IMG_C, IMG_H, IMG_W = 3, 16, 16

_VMEM = pl.BlockSpec(memory_space=pltpu.MemorySpace.VMEM)
_SMEM = pl.BlockSpec(memory_space=pltpu.MemorySpace.SMEM)


# ------------------------------- Sym module --------------------------------
OBJ2SYM = {'cube': [0, 0, 1], 'sphere': [0, 1, 0], 'cylinder': [1, 0, 0]}
REL2SYM = {'front': [0, 0, 0, 1], 'behind': [0, 0, 1, 0],
           'left': [0, 1, 0, 0], 'right': [1, 0, 0, 0]}


def sym_forward(texts):
    """texts: list (bsz) of lists (num_captions) of 'obj rel obj' strings."""
    rows = []
    for text_batch in texts:
        for text in text_batch:
            a, r, b = text.split()
            rows.append(OBJ2SYM[a] + REL2SYM[r] + OBJ2SYM[b])
    return jnp.asarray(rows, dtype=jnp.float32)        # (bsz*num_captions, 10)


# ------------------------------ fused Pallas kernel -------------------------
def _clip_sym_kernel(ls_ref, sym_ref, img_ref, slab_ref, o_ref,
                     *, layout, n_mlp, bsz, nc):
    """Fused CLIP_Sym forward.

    ls_ref  : SMEM (1,1) logit_scale (pre-exp).
    sym_ref : VMEM (bsz*nc, 10) symbolic one-hot features.
    img_ref : VMEM (bsz, C*H*W) flattened images.
    slab_ref: VMEM packed parameter slab; `layout` is a static tuple of
              (row0, rows, cols) entries in order [w0,b0,w1,b1,...,w_img,b_img]
              (MLP layer 0 already has the text encoder + concat folded in).
    """
    def view(idx):
        r0, rows, cols = layout[idx]        # static Python ints -> cheap slice
        return slab_ref[r0:r0 + rows, 0:cols]

    # --- text path: [folded text-encoder + concat + MLP] -> L2 normalize ----
    h = sym_ref[...]                                          # (bsz*nc, 10) f32
    for l in range(n_mlp):
        w = view(2 * l)
        b = view(2 * l + 1)
        # NOTE: for real CLIP-sized matmuls cast h/w to bf16 here (f32 accum).
        h = jnp.dot(h, w, preferred_element_type=jnp.float32) + b
        if l < n_mlp - 1:                       # ReLU on all but the out layer
            h = jnp.maximum(h, 0.0)
    # no epsilon: matches torch `x / x.norm(dim=-1, keepdim=True)`
    tf = h * lax.rsqrt(jnp.sum(h * h, axis=-1, keepdims=True))   # (bsz*nc, EMB)

    # --- image path: stand-in linear encoder -> L2 normalize ----------------
    w_i = view(2 * n_mlp)
    b_i = view(2 * n_mlp + 1)
    y = jnp.dot(img_ref[...], w_i, preferred_element_type=jnp.float32) + b_i
    imf = y * lax.rsqrt(jnp.sum(y * y, axis=-1, keepdims=True))  # (bsz, EMB)

    # Fold logit_scale.exp() into imf once (one (bsz,EMB) VPU multiply).
    scale = jnp.exp(ls_ref[0, 0] * jnp.ones((1, 1), jnp.float32))   # (1,1) EUP
    imf = imf * scale

    # --- logits: one MXU dot + block-diagonal extraction + one full store ---
    dn = (((1,), (1,)), ((), ()))            # contract EMB dims (A @ B.T, MXU)
    sim = lax.dot_general(imf, tf, dn,
                          preferred_element_type=jnp.float32)    # (bsz, bsz*nc)
    # keep only the block-diagonal entries sim[b, b*nc + c]
    col = lax.broadcasted_iota(jnp.int32, (bsz, bsz * nc), 1)
    row0 = lax.broadcasted_iota(jnp.int32, (bsz, bsz * nc), 0) * nc
    diag = jnp.logical_and(col >= row0, col < row0 + nc).astype(jnp.float32)
    # fold matrix F[j, c] = 1 iff j % nc == c  -> (bsz, bsz*nc) @ F = (bsz, nc)
    jrow = lax.broadcasted_iota(jnp.int32, (bsz * nc, nc), 0)
    ccol = lax.broadcasted_iota(jnp.int32, (bsz * nc, nc), 1)
    fold = ((jrow % nc) == ccol).astype(jnp.float32)
    out = jnp.dot(sim * diag, fold, preferred_element_type=jnp.float32)  # (bsz, nc)
    o_ref[...] = out.astype(o_ref.dtype)     # single full-block store


def clip_sym_fused(folded, sym_features, img_flat, *, bsz, num_captions):
    """Single pallas_call for the whole post-Sym forward pass."""
    slab = folded["slab"]
    layout = folded["layout"]
    n_mlp = folded["n_mlp"]
    ls = jnp.reshape(folded["logit_scale"], (1, 1)).astype(jnp.float32)

    m = bsz * num_captions
    mlp_flops = sum(2 * m * layout[2 * l][1] * layout[2 * l][2]
                    for l in range(n_mlp))
    img_flops = 2 * bsz * layout[2 * n_mlp][1] * layout[2 * n_mlp][2]
    logit_flops = 2 * bsz * EMB_DIM * m + 2 * bsz * m * num_captions
    cost = pl.CostEstimate(
        flops=int(mlp_flops + img_flops + logit_flops),
        transcendentals=int(m + bsz + 1),            # rsqrt per row + one exp
        bytes_accessed=int(4 * (slab.size + sym_features.size
                                + img_flat.size + bsz * num_captions + 1)))

    kern = functools.partial(_clip_sym_kernel, layout=layout, n_mlp=n_mlp,
                             bsz=bsz, nc=num_captions)
    return pl.pallas_call(
        kern,
        out_shape=jax.ShapeDtypeStruct((bsz, num_captions), jnp.float32),
        in_specs=[_SMEM, _VMEM, _VMEM, _VMEM],
        out_specs=_VMEM,
        cost_estimate=cost,
    )(ls, sym_features, img_flat, slab)


# ------------------------------ parameter init ------------------------------
def init_params(key):
    ks = jax.random.split(key, 10)
    d_in_mlp = EMB_DIM + 10
    img_flat = IMG_C * IMG_H * IMG_W

    def lin(k, din, dout, scale=0.05):
        kw, kb = jax.random.split(k)
        w = scale * jax.random.normal(kw, (din, dout), jnp.float32)
        b = scale * jax.random.normal(kb, (1, dout), jnp.float32)
        return w, b

    mlp_layers = [lin(ks[0], d_in_mlp, NEURONS)]                 # h_0
    for i in range(HIDDEN_LAYERS - 1):                           # h_mid
        mlp_layers.append(lin(ks[1 + i], NEURONS, NEURONS))
    mlp_layers.append(lin(ks[5], NEURONS, EMB_DIM))              # out (no ReLU)

    return {
        "mlp": mlp_layers,
        "txt": lin(ks[6], 10, EMB_DIM),          # stand-in CLIP text encoder
        "img": lin(ks[7], img_flat, EMB_DIM),    # stand-in CLIP image encoder
        "logit_scale": jnp.float32(jnp.log(1.0 / 0.07)),
    }


def _pack_params(arrays):
    """Pack 2-D f32 arrays into one slab; each starts on an 8-aligned row."""
    width = max(a.shape[1] for a in arrays)
    layout, r = [], 0
    for a in arrays:
        layout.append((r, int(a.shape[0]), int(a.shape[1])))
        r = -(-(r + a.shape[0]) // 8) * 8          # round up to sublane boundary
    slab = jnp.zeros((r, width), jnp.float32)
    for a, (r0, rows, cols) in zip(arrays, layout):
        slab = slab.at[r0:r0 + rows, :cols].set(a.astype(jnp.float32))
    return slab, tuple(layout)


def fold_params(params):
    """One-time prep: fold text encoder + concat into MLP layer 0, pack slab.

    concat([sym @ Wt + bt, sym]) @ W0 + b0
        == sym @ (Wt @ W0[:EMB] + W0[EMB:]) + (bt @ W0[:EMB] + b0)
    Exact identity (everything is linear); removes one matmul, one HBM
    intermediate and the XLA concatenate from the hot path.  All remaining
    weights/biases are then packed into a single VMEM slab (one DMA).
    """
    w_t, b_t = params["txt"]
    (w0, b0), *rest = params["mlp"]
    w0_clip, w0_sym = w0[:EMB_DIM], w0[EMB_DIM:]
    w0_eff = w_t @ w0_clip + w0_sym                  # (10, NEURONS)
    b0_eff = b_t @ w0_clip + b0                      # (1, NEURONS)
    mlp = [(w0_eff, b0_eff)] + list(rest)

    arrays = []
    for w, b in mlp:
        arrays += [w, b]
    arrays += list(params["img"])
    slab, layout = _pack_params(arrays)
    return {"slab": slab, "layout": layout, "n_mlp": len(mlp),
            "logit_scale": params["logit_scale"]}


# ------------------------------- forward pass -------------------------------
def clip_sym_forward(folded_params, batch_images, texts):
    # texts arrives as list (num_captions) of tuples (bsz) -> transpose
    texts = list(map(list, zip(*texts)))
    bsz = len(texts)
    num_captions = len(texts[0])

    # Sym features (pure Python lookup, no tensor compute)
    sym_features = sym_forward(texts)                        # (bsz*nc, 10)

    # TODO(synk): tokenization + frozen CLIP text/vision transformers are not
    # reproduced; linear stand-in encoders run inside the fused kernel.
    img_flat = batch_images.reshape(batch_images.shape[0], -1)   # (B, C*H*W)

    return clip_sym_fused(folded_params, sym_features, img_flat,
                          bsz=bsz, num_captions=num_captions)    # (bsz, nc)


# ---------------------------- pure-JAX reference ----------------------------
def clip_sym_reference(params, batch_images, texts):
    """Unfolded reference: explicit text encoder + concat, matches PyTorch."""
    texts = list(map(list, zip(*texts)))
    bsz, nc = len(texts), len(texts[0])
    sym = sym_forward(texts)
    w_t, b_t = params["txt"]
    clip_feat = sym @ w_t + b_t
    h = jnp.concatenate([clip_feat, sym], axis=-1)
    layers = params["mlp"]
    for i, (w, b) in enumerate(layers):
        h = h @ w + b
        if i < len(layers) - 1:
            h = jnp.maximum(h, 0.0)
    tf = h / jnp.linalg.norm(h, axis=-1, keepdims=True)
    tf = tf.reshape(bsz, nc, -1)
    w_i, b_i = params["img"]
    imf = batch_images.reshape(batch_images.shape[0], -1) @ w_i + b_i
    imf = imf / jnp.linalg.norm(imf, axis=-1, keepdims=True)
    return jnp.exp(params["logit_scale"]) * jnp.einsum("bcd,bd->bc", tf, imf)


# ----------------------------------- main -----------------------------------
if __name__ == "__main__":
    key = jax.random.PRNGKey(0)
    k_params, k_img = jax.random.split(key)
    params = init_params(k_params)
    folded = fold_params(params)       # one-time prep (fold + concat + pack)

    # dataloader-style texts: num_captions tuples, each of length bsz
    texts = [
        ("cube left sphere", "sphere right cylinder"),
        ("cylinder front cube", "cube behind sphere"),
        ("sphere left cube", "cylinder right sphere"),
        ("cube front cylinder", "sphere behind cube"),
    ]
    batch_images = jax.random.normal(
        k_img, (BSZ, IMG_C, IMG_H, IMG_W), jnp.float32)   # NCHW

    logits = clip_sym_forward(folded, batch_images, texts)
    logits = jax.block_until_ready(logits)

    ref = clip_sym_reference(params, batch_images, texts)
    assert logits.shape == (BSZ, NUM_CAPTIONS), logits.shape
    assert jnp.allclose(logits, ref, atol=2e-3, rtol=2e-3), (logits, ref)

    print("KERNEL_OK")
</pallas_src>

<mosaic_0001>
module attributes {stable_mosaic.version = 11 : i64} {
  func.func @_clip_sym_kernel(%arg0: memref<1x1xf32, #tpu.memory_space<smem>>, %arg1: memref<8x10xf32, #tpu.memory_space<vmem>>, %arg2: memref<2x768xf32, #tpu.memory_space<vmem>>, %arg3: memref<944x64xf32, #tpu.memory_space<vmem>>, %arg4: memref<2x4xf32, #tpu.memory_space<vmem>>) attributes {dimension_semantics = [], scalar_prefetch = 0 : i64, scratch_operands = 0 : i64, tpu.core_type = #tpu.core_type<tc>} {
    %c0 = arith.constant 0 : index
    %c0_0 = arith.constant 0 : index
    %0 = vector.load %arg1[%c0, %c0_0] : memref<8x10xf32, #tpu.memory_space<vmem>>, vector<8x10xf32>
    %c0_1 = arith.constant 0 : index
    %c0_2 = arith.constant 0 : index
    %1 = vector.load %arg3[%c0_1, %c0_2] : memref<944x64xf32, #tpu.memory_space<vmem>>, vector<10x64xf32>
    %c16 = arith.constant 16 : index
    %c0_3 = arith.constant 0 : index
    %2 = vector.load %arg3[%c16, %c0_3] : memref<944x64xf32, #tpu.memory_space<vmem>>, vector<1x64xf32>
    %cst = arith.constant dense<0.000000e+00> : vector<8x64xf32>
    %3 = tpu.matmul %0, %1, %cst {dimension_numbers = #tpu.dot_dimension_numbers<[1], [0], [0], [1], [0, 0, 1, 1], [], []>} : vector<8x10xf32>, vector<10x64xf32>, vector<8x64xf32> -> vector<8x64xf32>
    %4 = vector.broadcast %2 : vector<1x64xf32> to vector<8x64xf32>
    %5 = arith.addf %3, %4 : vector<8x64xf32>
    %cst_4 = arith.constant 0.000000e+00 : f32
    %6 = vector.broadcast %cst_4 : f32 to vector<8x64xf32>
    %7 = arith.maximumf %5, %6 : vector<8x64xf32>
    %c24 = arith.constant 24 : index
    %c0_5 = arith.constant 0 : index
    %8 = vector.load %arg3[%c24, %c0_5] : memref<944x64xf32, #tpu.memory_space<vmem>>, vector<64x64xf32>
    %c88 = arith.constant 88 : index
    %c0_6 = arith.constant 0 : index
    %9 = vector.load %arg3[%c88, %c0_6] : memref<944x64xf32, #tpu.memory_space<vmem>>, vector<1x64xf32>
    %cst_7 = arith.constant dense<0.000000e+00> : vector<8x64xf32>
    %10 = tpu.matmul %7, %8, %cst_7 {dimension_numbers = #tpu.dot_dimension_numbers<[1], [0], [0], [1], [0, 0, 1, 1], [], []>} : vector<8x64xf32>, vector<64x64xf32>, vector<8x64xf32> -> vector<8x64xf32>
    %11 = vector.broadcast %9 : vector<1x64xf32> to vector<8x64xf32>
    %12 = arith.addf %10, %11 : vector<8x64xf32>
    %cst_8 = arith.constant 0.000000e+00 : f32
    %13 = vector.broadcast %cst_8 : f32 to vector<8x64xf32>
    %14 = arith.maximumf %12, %13 : vector<8x64xf32>
    %c96 = arith.constant 96 : index
    %c0_9 = arith.constant 0 : index
    %15 = vector.load %arg3[%c96, %c0_9] : memref<944x64xf32, #tpu.memory_space<vmem>>, vector<64x32xf32>
    %c160 = arith.constant 160 : index
    %c0_10 = arith.constant 0 : index
    %16 = vector.load %arg3[%c160, %c0_10] : memref<944x64xf32, #tpu.memory_space<vmem>>, vector<1x32xf32>
    %cst_11 = arith.constant dense<0.000000e+00> : vector<8x32xf32>
    %17 = tpu.matmul %14, %15, %cst_11 {dimension_numbers = #tpu.dot_dimension_numbers<[1], [0], [0], [1], [0, 0, 1, 1], [], []>} : vector<8x64xf32>, vector<64x32xf32>, vector<8x32xf32> -> vector<8x32xf32>
    %18 = vector.broadcast %16 : vector<1x32xf32> to vector<8x32xf32>
    %19 = arith.addf %17, %18 : vector<8x32xf32>
    %20 = arith.mulf %19, %19 : vector<8x32xf32>
    %cst_12 = arith.constant dense<0.000000e+00> : vector<8xf32>
    %21 = vector.multi_reduction <add>, %20, %cst_12 [1] : vector<8x32xf32> to vector<8xf32>
    %22 = vector.shape_cast %21 : vector<8xf32> to vector<8x1xf32>
    %23 = math.rsqrt %22 : vector<8x1xf32>
    %24 = vector.broadcast %23 : vector<8x1xf32> to vector<8x32xf32>
    %25 = arith.mulf %19, %24 : vector<8x32xf32>
    %c168 = arith.constant 168 : index
    %c0_13 = arith.constant 0 : index
    %26 = vector.load %arg3[%c168, %c0_13] : memref<944x64xf32, #tpu.memory_space<vmem>>, vector<768x32xf32>
    %c936 = arith.constant 936 : index
    %c0_14 = arith.constant 0 : index
    %27 = vector.load %arg3[%c936, %c0_14] : memref<944x64xf32, #tpu.memory_space<vmem>>, vector<1x32xf32>
    %c0_15 = arith.constant 0 : index
    %c0_16 = arith.constant 0 : index
    %28 = vector.load %arg2[%c0_15, %c0_16] : memref<2x768xf32, #tpu.memory_space<vmem>>, vector<2x768xf32>
    %cst_17 = arith.constant dense<0.000000e+00> : vector<2x32xf32>
    %29 = tpu.matmul %28, %26, %cst_17 {dimension_numbers = #tpu.dot_dimension_numbers<[1], [0], [0], [1], [0, 0, 1, 1], [], []>} : vector<2x768xf32>, vector<768x32xf32>, vector<2x32xf32> -> vector<2x32xf32>
    %30 = vector.broadcast %27 : vector<1x32xf32> to vector<2x32xf32>
    %31 = arith.addf %29, %30 : vector<2x32xf32>
    %32 = arith.mulf %31, %31 : vector<2x32xf32>
    %cst_18 = arith.constant dense<0.000000e+00> : vector<2xf32>
    %33 = vector.multi_reduction <add>, %32, %cst_18 [1] : vector<2x32xf32> to vector<2xf32>
    %34 = vector.shape_cast %33 : vector<2xf32> to vector<2x1xf32>
    %35 = math.rsqrt %34 : vector<2x1xf32>
    %36 = vector.broadcast %35 : vector<2x1xf32> to vector<2x32xf32>
    %37 = arith.mulf %31, %36 : vector<2x32xf32>
    %c0_19 = arith.constant 0 : index
    %c0_20 = arith.constant 0 : index
    %38 = memref.load %arg0[%c0_19, %c0_20] : memref<1x1xf32, #tpu.memory_space<smem>>
    %cst_21 = arith.constant 1.000000e+00 : f32
    %39 = vector.broadcast %cst_21 : f32 to vector<1x1xf32>
    %40 = vector.broadcast %38 : f32 to vector<1x1xf32>
    %41 = arith.mulf %40, %39 : vector<1x1xf32>
    %42 = math.exp %41 : vector<1x1xf32>
    %43 = vector.broadcast %42 : vector<1x1xf32> to vector<2x32xf32>
    %44 = arith.mulf %37, %43 : vector<2x32xf32>
    %cst_22 = arith.constant dense<0.000000e+00> : vector<2x8xf32>
    %45 = tpu.matmul %44, %25, %cst_22 {dimension_numbers = #tpu.dot_dimension_numbers<[1], [1], [0], [0], [0, 0, 1, 0], [], []>} : vector<2x32xf32>, vector<8x32xf32>, vector<2x8xf32> -> vector<2x8xf32>
    %46 = tpu.iota {dimensions = array<i32: 1>} : vector<2x8xi32>
    %47 = tpu.iota {dimensions = array<i32: 0>} : vector<2x8xi32>
    %c4_i32 = arith.constant 4 : i32
    %48 = vector.broadcast %c4_i32 : i32 to vector<2x8xi32>
    %49 = arith.muli %47, %48 : vector<2x8xi32>
    %50 = arith.cmpi sge, %46, %49 : vector<2x8xi32>
    %c4_i32_23 = arith.constant 4 : i32
    %51 = vector.broadcast %c4_i32_23 : i32 to vector<2x8xi32>
    %52 = arith.addi %49, %51 : vector<2x8xi32>
    %53 = arith.cmpi slt, %46, %52 : vector<2x8xi32>
    %54 = arith.andi %50, %53 : vector<2x8xi1>
    %55 = arith.extui %54 : vector<2x8xi1> to vector<2x8xi32>
    %56 = arith.sitofp %55 : vector<2x8xi32> to vector<2x8xf32>
    %57 = tpu.iota {dimensions = array<i32: 0>} : vector<8x4xi32>
    %58 = tpu.iota {dimensions = array<i32: 1>} : vector<8x4xi32>
    %c4_i32_24 = arith.constant 4 : i32
    %c0_i32 = arith.constant 0 : i32
    %59 = arith.cmpi eq, %c4_i32_24, %c0_i32 : i32
    %c1_i32 = arith.constant 1 : i32
    %60 = arith.select %59, %c1_i32, %c4_i32_24 : i32
    %61 = vector.broadcast %60 : i32 to vector<8x4xi32>
    %62 = arith.remsi %57, %61 : vector<8x4xi32>
    %c0_i32_25 = arith.constant 0 : i32
    %63 = vector.broadcast %c0_i32_25 : i32 to vector<8x4xi32>
    %64 = arith.cmpi ne, %62, %63 : vector<8x4xi32>
    %c0_i32_26 = arith.constant 0 : i32
    %65 = vector.broadcast %c0_i32_26 : i32 to vector<8x4xi32>
    %66 = arith.cmpi slt, %62, %65 : vector<8x4xi32>
    %c0_i32_27 = arith.constant 0 : i32
    %67 = arith.cmpi slt, %60, %c0_i32_27 : i32
    %68 = vector.broadcast %67 : i1 to vector<8x4xi1>
    %69 = vector.broadcast %68 : vector<8x4xi1> to vector<8x4xi1>
    %70 = arith.xori %66, %69 : vector<8x4xi1>
    %71 = arith.andi %70, %64 : vector<8x4xi1>
    %72 = vector.broadcast %60 : i32 to vector<8x4xi32>
    %73 = arith.addi %62, %72 : vector<8x4xi32>
    %74 = arith.select %71, %73, %62 : vector<8x4xi1>, vector<8x4xi32>
    %75 = arith.cmpi eq, %74, %58 : vector<8x4xi32>
    %76 = arith.extui %75 : vector<8x4xi1> to vector<8x4xi32>
    %77 = arith.sitofp %76 : vector<8x4xi32> to vector<8x4xf32>
    %78 = arith.mulf %45, %56 : vector<2x8xf32>
    %cst_28 = arith.constant dense<0.000000e+00> : vector<2x4xf32>
    %79 = tpu.matmul %78, %77, %cst_28 {dimension_numbers = #tpu.dot_dimension_numbers<[1], [0], [0], [1], [0, 0, 1, 1], [], []>} : vector<2x8xf32>, vector<8x4xf32>, vector<2x4xf32> -> vector<2x4xf32>
    %c0_29 = arith.constant 0 : index
    %c0_30 = arith.constant 0 : index
    %80 = vector.load %arg4[%c0_29, %c0_30] : memref<2x4xf32, #tpu.memory_space<vmem>>, vector<2x4xf32>
    tpu.vector_store %arg4[%c0_29, %c0_30], %79 {strides = array<i32>} : memref<2x4xf32, #tpu.memory_space<vmem>>, vector<2x4xf32>,
    return
  }
}

</mosaic_0001>

<bundles_post_ra>
// kernel: tpu_custom_call.1
= control target key start
LH: loop header
LB: loop body
LE: loop exit
PB: predicated region body
PF: predicated region fallthrough
CT: control target
= control target key end

     0   :  { %vm28_vm0 = vcmask 1041408   ;;  %vm24_vm1 = vcmask 80896   ;;  %s941_s0 = inlined_call_operand.<no memory space> [shape: f32[1,1], index: 0, kind: input, shape index: {}]   ;;  %s942_s1 = inlined_call_operand.vmem [shape: f32[8,10], index: 1, kind: input, shape index: {}]   ;;  %s943_s2 = inlined_call_operand.vmem [shape: f32[2,768], index: 2, kind: input, shape index: {}]   ;;  %s944_s3 = inlined_call_operand.vmem [shape: f32[944,64], index: 3, kind: input, shape index: {}]   ;;  %s945_s4 = inlined_call_operand.hbm [shape: f32[2,4], index: 4, kind: output, shape index: {}]  }
   0x1   :  { %v21_v0 = vld [vmem:[%s944_s3 + $0x8] sm:$0x3]  ;;  %v20_v1 = vld [vmem:[%s944_s3] sm:$0xff]  ;;  %v60_v3 = vld [vmem:[%s944_s3 + $0x50] sm:$0xff] }
   0x2   :  { %490 = vmatpush.msk.msra.mxu1 %vm28_vm0, %v21_v0  ;;  %v19_v2 = vld [vmem:[%s942_s1] sm:$0xff]  ;;  %v59_v4 = vld [vmem:[%s944_s3 + $0x48] sm:$0xff] }
   0x4   :  { %47 = vmatpush.msra.mxu1 %v20_v1 }
   0x5   :  { %491 = vmatmul.msk.f32.vlgmr.msra.gmra.mxu1 %vm24_vm1, %v19_v2 }
   0x6   :  { %10 = vsyncpa [#allocation4], 0  ;;  %75 = vmatpush.msrb.mxu1 %v60_v3  ;;  %v58_v5 = vld [vmem:[%s944_s3 + $0x40] sm:$0xff]  ;;  %v57_v6 = vld [vmem:[%s944_s3 + $0x38] sm:$0xff]  ;;  %vm63_vm2 = vcmask 523264   ;;  %vm122_vm3 = vcmask 261120  }
   0x7   :  { %v56_v7 = vld [vmem:[%s944_s3 + $0x30] sm:$0xff]  ;;  %v55_v8 = vld [vmem:[%s944_s3 + $0x28] sm:$0xff]  ;;  %v54_v9 = vld [vmem:[%s944_s3 + $0x20] sm:$0xff]  ;;  %vm375_vm4 = vcmask 254976   ;;  %vm448_vm15 = vcmask 64512   ;;  %s481_s17 = sshll.u32 %s945_s4, 4  ;;  %s482_s17 = int_to_ptr.hbm [resolvable:$true] %s481_s17 }
   0x8   :  { %76 = vmatpush.msrb.mxu1 %v59_v4  ;;  %v53_v10 = vld [vmem:[%s944_s3 + $0x18] sm:$0xff]  ;;  %v152_v11 = vld [vmem:[%s944_s3 + $0x120] sm:$0xff]  ;;  %v150_v14 = vld [vmem:[%s944_s3 + $0x110] sm:$0xff]  ;;  %vm472_vm0 = vcmask 25600  }
   0x9   :  { %v151_v12 = vld [vmem:[%s944_s3 + $0x118] sm:$0xff]  ;;  %254 = vmatpush.msra.mxu3 %v152_v11  ;;  %v168_v13 = vld [vmem:[%s944_s3 + $0x1a0] sm:$0xff]  ;;  %v166_v16 = vld [vmem:[%s944_s3 + $0x190] sm:$0xff] }
   0xa   :  { %77 = vmatpush.msrb.mxu1 %v58_v5  ;;  %274 = vmatpush.msra.mxu0 %v168_v13  ;;  %v167_v15 = vld [vmem:[%s944_s3 + $0x198] sm:$0xff]  ;;  %v149_v18 = vld [vmem:[%s944_s3 + $0x108] sm:$0xff]  ;;  %v94_v19 = vld [vmem:[%s944_s3 + $0x90] sm:$0xff] }
   0xb   :  { %255 = vmatpush.msra.mxu3 %v151_v12  ;;  %v95_v17 = vld [vmem:[%s944_s3 + $0x98] sm:$0xff]  ;;  %v165_v20 = vld [vmem:[%s944_s3 + $0x188] sm:$0xff]  ;;  %v148_v22 = vld [vmem:[%s944_s3 + $0x100] sm:$0xff] }
   0xc   :  { %78 = vmatpush.msrb.mxu1 %v57_v6  ;;  %275 = vmatpush.msra.mxu0 %v167_v15  ;;  %v93_v21 = vld [vmem:[%s944_s3 + $0x88] sm:$0xff]  ;;  %v164_v23 = vld [vmem:[%s944_s3 + $0x180] sm:$0xff]  ;;  %v147_v25 = vld [vmem:[%s944_s3 + $0xf8] sm:$0xff] }
   0xd   :  { %109 = vmatpush.msra.mxu2 %v95_v17  ;;  %256 = vmatpush.msra.mxu3 %v150_v14  ;;  %v92_v24 = vld [vmem:[%s944_s3 + $0x80] sm:$0xff]  ;;  %v163_v26 = vld [vmem:[%s944_s3 + $0x178] sm:$0xff]  ;;  %v146_v28 = vld [vmem:[%s944_s3 + $0xf0] sm:$0xff] }
   0xe   :  { %79 = vmatpush.msrb.mxu1 %v56_v7  ;;  %276 = vmatpush.msra.mxu0 %v166_v16  ;;  %v91_v27 = vld [vmem:[%s944_s3 + $0x78] sm:$0xff]  ;;  %v162_v29 = vld [vmem:[%s944_s3 + $0x170] sm:$0xff]  ;;  %v145_v31 = vld [vmem:[%s944_s3 + $0xe8] sm:$0xff] }
   0xf   :  { %110 = vmatpush.msra.mxu2 %v94_v19  ;;  %257 = vmatpush.msra.mxu3 %v149_v18  ;;  %v90_v30 = vld [vmem:[%s944_s3 + $0x70] sm:$0xff]  ;;  %v161_v32 = vld [vmem:[%s944_s3 + $0x168] sm:$0xff]  ;;  %v184_v34 = vld [vmem:[%s944_s3 + $0x220] sm:$0xff] }
  0x10   :  { %80 = vmatpush.msrb.mxu1 %v55_v8  ;;  %277 = vmatpush.msra.mxu0 %v165_v20  ;;  %v89_v33 = vld [vmem:[%s944_s3 + $0x68] sm:$0xff]  ;;  %v144_v35 = vld [vmem:[%s944_s3 + $0xe0] sm:$0xff]  ;;  %v183_v36 = vld [vmem:[%s944_s3 + $0x218] sm:$0xff] }
  0x11   :  { %111 = vmatpush.msra.mxu2 %v93_v21  ;;  %258 = vmatpush.msra.mxu3 %v148_v22  ;;  %v160_v37 = vld [vmem:[%s944_s3 + $0x160] sm:$0xff]  ;;  %v143_v39 = vld [vmem:[%s944_s3 + $0xd8] sm:$0xff]  ;;  %v182_v42 = vld [vmem:[%s944_s3 + $0x210] sm:$0xff] }
  0x12   :  { %81 = vmatpush.msrb.mxu1 %v54_v9  ;;  %278 = vmatpush.msra.mxu0 %v164_v23  ;;  %v88_v38 = vld [vmem:[%s944_s3 + $0x60] sm:$0xff]  ;;  %v159_v41 = vld [vmem:[%s944_s3 + $0x158] sm:$0xff]  ;;  %v142_v43 = vld [vmem:[%s944_s3 + $0xd0] sm:$0xff] }
  0x13   :  { %112 = vmatpush.msra.mxu2 %v92_v24  ;;  %259 = vmatpush.msra.mxu3 %v147_v25  ;;  %v200_v40 = vld [vmem:[%s944_s3 + $0x2a0] sm:$0xff]  ;;  %v199_v44 = vld [vmem:[%s944_s3 + $0x298] sm:$0xff]  ;;  %v158_v45 = vld [vmem:[%s944_s3 + $0x150] sm:$0xff] }
  0x14   :  { %82 = vmatpush.msrb.mxu1 %v53_v10  ;;  %279 = vmatpush.msra.mxu0 %v163_v26  ;;  %v181_v46 = vld [vmem:[%s944_s3 + $0x208] sm:$0xff]  ;;  %v198_v48 = vld [vmem:[%s944_s3 + $0x290] sm:$0xff]  ;;  %v180_v50 = vld [vmem:[%s944_s3 + $0x200] sm:$0xff] }
  0x15   :  { %113 = vmatpush.msra.mxu2 %v91_v27  ;;  %260 = vmatpush.msra.mxu3 %v146_v28  ;;  %v141_v47 = vld [vmem:[%s944_s3 + $0xc8] sm:$0xff]  ;;  %v140_v51 = vld [vmem:[%s944_s3 + $0xc0] sm:$0xff]  ;;  %v179_v54 = vld [vmem:[%s944_s3 + $0x1f8] sm:$0xff] }
  0x16   :  { %280 = vmatpush.msra.mxu0 %v162_v29  ;;  %294 = vmatpush.msra.mxu1 %v184_v34  ;;  %v157_v49 = vld [vmem:[%s944_s3 + $0x148] sm:$0xff]  ;;  %v156_v53 = vld [vmem:[%s944_s3 + $0x140] sm:$0xff]  ;;  %v503_v55 = vld [vmem:[%s944_s3 + $0x10] ss:$0 sm:$0xff] }
  0x17   :  { %114 = vmatpush.msra.mxu2 %v90_v30  ;;  %261 = vmatpush.msra.mxu3 %v145_v31  ;;  %v197_v52 = vld [vmem:[%s944_s3 + $0x288] sm:$0xff]  ;;  %v139_v56 = vld [vmem:[%s944_s3 + $0xb8] sm:$0xff]  ;;  %v196_v57 = vld [vmem:[%s944_s3 + $0x280] sm:$0xff] }
  0x18   :  { %281 = vmatpush.msra.mxu0 %v161_v32  ;;  %295 = vmatpush.msra.mxu1 %v183_v36  ;;  %v155_v58 = vld [vmem:[%s944_s3 + $0x138] sm:$0xff]  ;;  %v178_v59 = vld [vmem:[%s944_s3 + $0x1f0] sm:$0xff]  ;;  %v137_v1 = vld [vmem:[%s944_s3 + $0xa8] sm:$0xff] }
  0x19   :  { %115 = vmatpush.msra.mxu2 %v89_v33  ;;  %262 = vmatpush.msra.mxu3 %v144_v35  ;;  %v138_v60 = vld [vmem:[%s944_s3 + $0xb0] sm:$0xff]  ;;  %v195_v61 = vld [vmem:[%s944_s3 + $0x278] sm:$0xff]  ;;  %v216_v3 = vld [vmem:[%s944_s3 + $0x320] sm:$0xff] }
  0x1a   :  { %282 = vmatpush.msra.mxu0 %v160_v37  ;;  %296 = vmatpush.msra.mxu1 %v182_v42  ;;  %v154_v63 = vld [vmem:[%s944_s3 + $0x130] sm:$0xff]  ;;  %v153_v5 = vld [vmem:[%s944_s3 + $0x128] sm:$0xff]  ;;  %v215_v7 = vld [vmem:[%s944_s3 + $0x318] sm:$0xff] }
  0x1b   :  { %116 = vmatpush.msra.mxu2 %v88_v38  ;;  %263 = vmatpush.msra.mxu3 %v143_v39  ;;  %v194_v2 = vld [vmem:[%s944_s3 + $0x270] sm:$0xff]  ;;  %v193_v6 = vld [vmem:[%s944_s3 + $0x268] sm:$0xff]  ;;  %v232_v8 = vld [vmem:[%s944_s3 + $0x3a0] sm:$0xff] }
  0x1c   :  { %283 = vmatpush.msra.mxu0 %v159_v41  ;;  %297 = vmatpush.msra.mxu1 %v181_v46  ;;  %v192_v9 = vld [vmem:[%s944_s3 + $0x260] sm:$0xff]  ;;  %v214_v10 = vld [vmem:[%s944_s3 + $0x310] sm:$0xff]  ;;  %v231_v11 = vld [vmem:[%s944_s3 + $0x398] sm:$0xff] }
  0x1d   :  { %314 = vmatpush.msrb.mxu2 %v200_v40  ;;  %264 = vmatpush.msra.mxu3 %v142_v43  ;;  %v213_v12 = vld [vmem:[%s944_s3 + $0x308] sm:$0xff]  ;;  %v230_v13 = vld [vmem:[%s944_s3 + $0x390] sm:$0xff]  ;;  %v212_v14 = vld [vmem:[%s944_s3 + $0x300] sm:$0xff] }
  0x1e   :  { %284 = vmatpush.msra.mxu0 %v158_v45  ;;  %298 = vmatpush.msra.mxu1 %v180_v50  ;;  %v229_v15 = vld [vmem:[%s944_s3 + $0x388] sm:$0xff]  ;;  %v211_v16 = vld [vmem:[%s944_s3 + $0x2f8] sm:$0xff]  ;;  %v210_v17 = vld [vmem:[%s944_s3 + $0x2f0] sm:$0xff] }
  0x1f   :  { %315 = vmatpush.msrb.mxu2 %v199_v44  ;;  %265 = vmatpush.msra.mxu3 %v141_v47  ;;  %v209_v18 = vld [vmem:[%s944_s3 + $0x2e8] sm:$0xff]  ;;  %v234_v19 = vld [vmem:[%s943_s2] sm:$0xff]  ;;  %v191_v21 = vld [vmem:[%s944_s3 + $0x258] sm:$0xff] }
  0x20   :  { %285 = vmatpush.msra.mxu0 %v157_v49  ;;  %299 = vmatpush.msra.mxu1 %v179_v54  ;;  %v177_v20 = vld [vmem:[%s944_s3 + $0x1e8] sm:$0xff]  ;;  %v208_v22 = vld [vmem:[%s944_s3 + $0x2e0] sm:$0xff]  ;;  %239 = vst [vmem:[#allocation1] ss:$4 sm:$0xff] %v234_v19  ;;  %v190_v25 = vld [vmem:[%s944_s3 + $0x250] sm:$0xff] }
  0x21   :  { %316 = vmatpush.msrb.mxu2 %v198_v48  ;;  %266 = vmatpush.msra.mxu3 %v140_v51  ;;  %v228_v23 = vld [vmem:[%s944_s3 + $0x380] sm:$0xff]  ;;  %v207_v26 = vld [vmem:[%s944_s3 + $0x2d8] sm:$0xff]  ;;  %v189_v29 = vld [vmem:[%s944_s3 + $0x248] sm:$0xff] }
  0x22   :  { %286 = vmatpush.msra.mxu0 %v156_v53  ;;  %300 = vmatpush.msra.mxu1 %v178_v59  ;;  %v176_v24 = vld [vmem:[%s944_s3 + $0x1e0] sm:$0xff]  ;;  %v227_v27 = vld [vmem:[%s944_s3 + $0x378] sm:$0xff]  ;;  %v206_v30 = vld [vmem:[%s944_s3 + $0x2d0] sm:$0xff] }
  0x23   :  { %317 = vmatpush.msrb.mxu2 %v197_v52  ;;  %267 = vmatpush.msra.mxu3 %v139_v56  ;;  %v175_v28 = vld [vmem:[%s944_s3 + $0x1d8] sm:$0xff]  ;;  %v226_v31 = vld [vmem:[%s944_s3 + $0x370] sm:$0xff]  ;;  %v188_v33 = vld [vmem:[%s944_s3 + $0x240] sm:$0xff] }
  0x24   :  { %287 = vmatpush.msra.mxu0 %v155_v58  ;;  %301 = vmatpush.msra.mxu1 %v177_v20  ;;  %v174_v32 = vld [vmem:[%s944_s3 + $0x1d0] sm:$0xff]  ;;  %v205_v34 = vld [vmem:[%s944_s3 + $0x2c8] sm:$0xff]  ;;  %v187_v38 = vld [vmem:[%s944_s3 + $0x238] sm:$0xff] }
  0x25   :  { %318 = vmatpush.msrb.mxu2 %v196_v57  ;;  %268 = vmatpush.msra.mxu3 %v138_v60  ;;  %v225_v35 = vld [vmem:[%s944_s3 + $0x368] sm:$0xff]  ;;  %v204_v39 = vld [vmem:[%s944_s3 + $0x2c0] sm:$0xff]  ;;  %v186_v42 = vld [vmem:[%s944_s3 + $0x230] sm:$0xff] }
  0x26   :  { %288 = vmatpush.msra.mxu0 %v154_v63  ;;  %302 = vmatpush.msra.mxu1 %v176_v24  ;;  %v173_v37 = vld [vmem:[%s944_s3 + $0x1c8] sm:$0xff]  ;;  %v224_v40 = vld [vmem:[%s944_s3 + $0x360] sm:$0xff]  ;;  %v203_v43 = vld [vmem:[%s944_s3 + $0x2b8] sm:$0xff]  ;;  %v421_v24 = vlaneseq }
  0x27   :  { %319 = vmatpush.msrb.mxu2 %v195_v61  ;;  %269 = vmatpush.msra.mxu3 %v137_v1  ;;  %v242_v36 = vld.sshfl [vmem:[#allocation1] sm:$0xff pattern:$0x73625140]  ;;  %v223_v44 = vld [vmem:[%s944_s3 + $0x358] sm:$0xff]  ;;  %v185_v46 = vld [vmem:[%s944_s3 + $0x228] sm:$0xff] }
  0x28   :  { %289 = vmatpush.msra.mxu0 %v153_v5  ;;  %303 = vmatpush.msra.mxu1 %v175_v28  ;;  %v172_v41 = vld [vmem:[%s944_s3 + $0x1c0] sm:$0xff]  ;;  %v171_v45 = vld [vmem:[%s944_s3 + $0x1b8] sm:$0xff]  ;;  %v202_v47 = vld [vmem:[%s944_s3 + $0x2b0] sm:$0xff] }
  0x29   :  { %320 = vmatpush.msrb.mxu2 %v194_v2  ;;  %334 = vmatpush.msrb.mxu3 %v216_v3  ;;  %v222_v48 = vld [vmem:[%s944_s3 + $0x350] sm:$0xff]  ;;  %v235_v49 = vld [vmem:[%s943_s2 + $0x8] sm:$0xf]  ;;  %v219_v57 = vld [vmem:[%s944_s3 + $0x338] sm:$0xff] }
  0x2a   :  { %354 = vmatpush.msrb.mxu0 %v232_v8  ;;  %304 = vmatpush.msra.mxu1 %v174_v32  ;;  %241 = vst [vmem:[#allocation1 + $0x20] ss:$4 sm:$0xff] %v235_v49  ;;  %v170_v50 = vld [vmem:[%s944_s3 + $0x1b0] sm:$0xff]  ;;  %v201_v51 = vld [vmem:[%s944_s3 + $0x2a8] sm:$0xff]  ;;  %v505_v5 = vld [vmem:[%s944_s3 + $0xa0] ss:$0 sm:$0xff] }
  0x2b   :  { %321 = vmatpush.msrb.mxu2 %v193_v6  ;;  %335 = vmatpush.msrb.mxu3 %v215_v7  ;;  %v221_v52 = vld [vmem:[%s944_s3 + $0x348] sm:$0xff]  ;;  %v244_v56 = vld.sshfl [vmem:[#allocation1 + $0x10] sm:$0xff pattern:$0x73625140] }
  0x2c   :  { %355 = vmatpush.msrb.mxu0 %v231_v11  ;;  %270 = vmatmul.f32.vlgmr.msra.gmra.mxu3 %v242_v36  ;;  %v243_v53 = vld.sshfl [vmem:[#allocation1 + $0x8] sm:$0xff pattern:$0x73625140]  ;;  %v218_v59 = vld [vmem:[%s944_s3 + $0x330] sm:$0xff]  ;;  %v391_v36 = vstv %s941_s0  ;;  %s541_s0 = smov [#allocation3]  }
  0x2d   :  { %322 = vmatpush.msrb.mxu2 %v192_v9  ;;  %336 = vmatpush.msrb.mxu3 %v214_v10  ;;  %v169_v54 = vld [vmem:[%s944_s3 + $0x1a8] sm:$0xff]  ;;  %v245_v2 = vld.sshfl [vmem:[#allocation1 + $0x18] sm:$0xff pattern:$0x73625140]  ;;  %s479_s14 = sshll.u32 %s541_s0, 4  ;;  %s480_s14 = int_to_ptr.vmem [resolvable:$true] %s479_s14 }
  0x2e   :  { %356 = vmatpush.msrb.mxu0 %v230_v13  ;;  %305 = vmatpush.msra.mxu1 %v173_v37  ;;  %v217_v60 = vld [vmem:[%s944_s3 + $0x328] sm:$0xff] }
  0x2f   :  { %337 = vmatpush.msrb.mxu3 %v213_v12  ;;  %323 = vmatpush.msrb.mxu2 %v191_v21  ;;  %v506_v3 = vld [vmem:[%s944_s3 + $0x3a8] ss:$0 sm:$0xff] }
  0x30   :  { %357 = vmatpush.msrb.mxu0 %v229_v15  ;;  %306 = vmatpush.msra.mxu1 %v172_v41 }
  0x31   :  { %338 = vmatpush.msrb.mxu3 %v212_v14  ;;  %324 = vmatpush.msrb.mxu2 %v190_v25  ;;  %v246_v58 = vld.sshfl [vmem:[#allocation1 + $0x20] sm:$0xff pattern:$0x73625140]  ;;  %v247_v61 = vld.sshfl [vmem:[#allocation1 + $0x28] sm:$0xff pattern:$0x73625140] }
  0x32   :  { %358 = vmatpush.msrb.mxu0 %v228_v23  ;;  %307 = vmatpush.msra.mxu1 %v171_v45  ;;  %v424_v25 = vshrl.u32 %v421_v24, 7 }
  0x33   :  { %339 = vmatpush.msrb.mxu3 %v211_v16  ;;  %325 = vmatpush.msrb.mxu2 %v189_v29 }
  0x34   :  { %359 = vmatpush.msrb.mxu0 %v227_v27  ;;  %308 = vmatpush.msra.mxu1 %v170_v50  ;;  %v422_v27 = vand.u32 127, %v421_v24  ;;  %v436_v28 = vand.u32 3, %v424_v25  ;;  %v425_v50 = vmul.u32 4, %v424_v25 }
  0x35   :  { %340 = vmatpush.msrb.mxu3 %v210_v17  ;;  %326 = vmatpush.msrb.mxu2 %v188_v33 }
  0x36   :  { %360 = vmatpush.msrb.mxu0 %v226_v31  ;;  %309 = vmatpush.msra.mxu1 %v169_v54  ;;  %vm444_vm5 = vcmp.eq.s32.totalorder %v436_v28, %v422_v27  ;;  %v539_v31 = vmov 1.0   ;;  %vm426_vm12 = vcmp.ge.s32.totalorder %v422_v27, %v425_v50 }
  0x37   :  { %341 = vmatpush.msrb.mxu3 %v209_v18  ;;  %327 = vmatpush.msrb.mxu2 %v187_v38 }
  0x38   :  { %361 = vmatpush.msrb.mxu0 %v225_v35 }
  0x39   :  { %342 = vmatpush.msrb.mxu3 %v208_v22  ;;  %328 = vmatpush.msrb.mxu2 %v186_v42 }
  0x3a   :  { %362 = vmatpush.msrb.mxu0 %v224_v40  ;;  %v392_v40 = vmul.f32 1.442695, %v391_v36 }
  0x3b   :  { %343 = vmatpush.msrb.mxu3 %v207_v26  ;;  %329 = vmatpush.msrb.mxu2 %v185_v46 }
  0x3c   :  { %363 = vmatpush.msrb.mxu0 %v223_v44 }
  0x3d   :  { %344 = vmatpush.msrb.mxu3 %v206_v30  ;;  %290 = vmatmul.f32.vlgmr.msra.gmra.mxu0 %v243_v53 }
  0x3e   :  { %364 = vmatpush.msrb.mxu0 %v222_v48 }
  0x3f   :  { %345 = vmatpush.msrb.mxu3 %v205_v34 }
  0x40   :  { %365 = vmatpush.msrb.mxu0 %v221_v52  ;;  %v540_v52 = vmov 0.0  }
  0x41   :  { %346 = vmatpush.msrb.mxu3 %v204_v39 }
  0x43   :  { %347 = vmatpush.msrb.mxu3 %v203_v43 }
  0x45   :  { %348 = vmatpush.msrb.mxu3 %v202_v47 }
  0x47   :  { %349 = vmatpush.msrb.mxu3 %v201_v51  ;;  %v427_v51 = vadd.s32 4, %v425_v50 }
  0x48   :  { %350 = vmatmul.f32.vlgmr.msrb.gmra.mxu3 %v246_v58 }
  0x49   :  { %vm428_vm13 = vcmp.lt.s32.totalorder %v422_v27, %v427_v51 }
  0x4a   :  { %vm429_vm14 = vmand %vm426_vm12, %vm428_vm13 }
  0x4b   :  { %v496_v53 = vsel %vm429_vm14, 1.0, %v540_v52 }
  0x82   :  { %v49_v62 = vpop.f32.mrf.mxu1 }
  0x83   :  { %v50_v0 = vadd.f32 %v503_v55, %v49_v62  ;;  %v220_v55 = vld [vmem:[%s944_s3 + $0x340] sm:$0xff]  ;;  %v504_v62 = vld [vmem:[%s944_s3 + $0x58] ss:$0 sm:$0xff] }
  0x84   :  { %366 = vmatpush.msrb.mxu0 %v220_v55 }
  0x85   :  { %v52_v4 = vmax.f32 %v50_v0, 0.0 }
  0x86   :  { %367 = vmatpush.msrb.mxu0 %v219_v57 }
  0x87   :  { %492 = vmatmul.msk.f32.vlgmr.msrb.gmra.mxu1 %vm63_vm2, %v52_v4 }
  0x88   :  { %368 = vmatpush.msrb.mxu0 %v218_v59 }
  0x8a   :  { %369 = vmatpush.msrb.mxu0 %v217_v60 }
  0x8b   :  { %370 = vmatmul.f32.vlgmr.msrb.gmra.mxu0 %v247_v61 }
  0x8f   :  { %310 = vmatmul.f32.vlgmr.msra.gmra.mxu1 %v244_v56 }
  0xaf   :  { %v271_v4 = vpop.f32.mrf.mxu3 }
  0xb0   :  { %v272_v6 = vadd.f32 %v506_v3, %v271_v4 }
  0xba   :  { %v291_v7 = vpop.f32.mrf.mxu0 }
  0xbb   :  { %v292_v10 = vadd.f32 %v291_v7, %v272_v6 }
  0xcb   :  { %v351_v16 = vpop.f32.mrf.mxu3 }
 0x104   :  { %v84_v63 = vpop.f32.mrf.mxu1 }
 0x105   :  { %v85_v0 = vadd.f32 %v504_v62, %v84_v63 }
 0x107   :  { %v87_v1 = vmax.f32 %v85_v0, 0.0 }
 0x108   :  { %v371_v18 = vpop.f32.mrf.mxu0 }
 0x109   :  { %493 = vmatmul.msk.f32.vlgmr.msra.gmra.mxu2 %vm63_vm2, %v87_v1 }
 0x10a   :  { %498 = vmatpush.msk.msra.mxu2 %vm444_vm5, %v539_v31 }
 0x10c   :  { %v311_v11 = vpop.f32.mrf.mxu1 }
 0x10d   :  { %v312_v13 = vadd.f32 %v311_v11, %v292_v10 }
 0x111   :  { %330 = vmatmul.f32.vlgmr.msrb.gmra.mxu2 %v245_v2 }
 0x18c   :  { %v118_v8 = vpop.f32.mrf.mxu2 }
 0x18d   :  { %v119_v9 = vadd.f32 %v505_v5, %v118_v8 }
 0x18f   :  { %v121_v12 = vmul.f32 %v119_v9, %v119_v9 }
 0x191   :  { %v123_v14 = vsel %vm122_vm3, %v121_v12, 0.0 }
 0x192   :  { %124 = vadd.xlane.f32.xlu0 %v123_v14 }
 0x194   :  { %v331_v15 = vpop.f32.mrf.mxu2 }
 0x195   :  { %v332_v17 = vadd.f32 %v331_v15, %v312_v13 }
 0x197   :  { %v352_v19 = vadd.f32 %v351_v16, %v332_v17 }
 0x199   :  { %v372_v20 = vadd.f32 %v371_v18, %v352_v19 }
 0x19b   :  { %v374_v21 = vmul.f32 %v372_v20, %v372_v20 }
 0x19d   :  { %v376_v22 = vsel %vm375_vm4, %v374_v21, 0.0 }
 0x19e   :  { %377 = vadd.xlane.f32.xlu0 %v376_v22 }
 0x205   :  { %v125_v23 = vpop.xlane.xlu0 %124 }
 0x206   :  { %507 = vrsqrt.f32 %v125_v23  ;;  %vm132_vm7 = vweird.f32 %v125_v23 }
 0x20c   :  { %v508_v26 = vpop.eup %507 }
 0x20d   :  { %v127_v29 = vmul.f32 %v508_v26, %v125_v23  ;;  %vm133_vm6 = vweird.f32 %v508_v26 }
 0x20e   :  { %vm134_vm8 = vmor %vm132_vm7, %vm133_vm6 }
 0x20f   :  { %v128_v30 = vmul.f32 %v508_v26, %v127_v29 }
 0x211   :  { %v129_v32 = vmul.f32 0.5, %v128_v30  ;;  %v378_v33 = vpop.xlane.xlu0 %377 }
 0x212   :  { %509 = vrsqrt.f32 %v378_v33  ;;  %vm385_vm10 = vweird.f32 %v378_v33 }
 0x213   :  { %v130_v34 = vsub.f32 1.5, %v129_v32  ;;  %511 = vpow2.f32 %v392_v40 }
 0x215   :  { %v131_v35 = vmul.f32 %v508_v26, %v130_v34 }
 0x217   :  { %v135_v37 = vsel %vm134_vm8, %v508_v26, %v131_v35 }
 0x218   :  { %v510_v38 = vpop.eup %509  ;;  %v136_v39 = vmul.f32 %v135_v37, %v119_v9 }
 0x219   :  { %v380_v41 = vmul.f32 %v510_v38, %v378_v33  ;;  %vm386_vm9 = vweird.f32 %v510_v38  ;;  %v512_v46 = vpop.eup %511 }
 0x21a   :  { %494 = vmatpush.xpose.msk.msrb.mxu1 %vm122_vm3, %v136_v39  ;;  %vm387_vm11 = vmor %vm385_vm10, %vm386_vm9 }
 0x21b   :  { %v381_v42 = vmul.f32 %v510_v38, %v380_v41 }
 0x21d   :  { %v382_v43 = vmul.f32 0.5, %v381_v42 }
 0x21f   :  { %v383_v44 = vsub.f32 1.5, %v382_v43 }
 0x221   :  { %v384_v45 = vmul.f32 %v510_v38, %v383_v44 }
 0x223   :  { %v388_v47 = vsel %vm387_vm11, %v510_v38, %v384_v45 }
 0x224   :  { %v389_v48 = vmul.f32 %v388_v47, %v372_v20 }
 0x226   :  { %v394_v49 = vmul.f32 %v512_v46, %v389_v48 }
 0x228   :  { %495 = vmatmul.msk.f32.vlgmr.msrb.gmra.mxu1 %vm122_vm3, %v394_v49 }
 0x2a5   :  { %v418_v54 = vpop.f32.mrf.mxu1 }
 0x2a6   :  { %v447_v55 = vmul.f32 %v496_v53, %v418_v54 }
 0x2a8   :  { %499 = vmatmul.msk.f32.vlgmr.msra.gmra.mxu2 %vm448_vm15, %v447_v55 }
 0x32b   :  { %v469_v56 = vpop.f32.mrf.mxu2 }
 0x32c   :  { %473 = vst.msk [vmem:[#allocation3] sm:$0x3] %vm472_vm0, %v469_v56 }
 0x32d   :  { %484 = dma.vmem_to_hbm [thread:$0]  %s480_s14, 32, %s482_s17, [#allocation4]  }
 0x32e   :  { %537 = dma.done.wait [#allocation4], 32  }
 0x32f   :  { %538 = vsyncadd [#allocation4], 4294967264 }
 0x330   :  { %489 = vsyncpa [#allocation4], 1 }

</bundles_post_ra>
